<compile_context>
chip_gen: v7x
topology: tpu7x:2x2x1
jax: 0.10.0
libtpu: 0.0.40
codegen_flags: <defaults>
</compile_context>

<pallas_src>
import jax
import jax.numpy as jnp
from jax.experimental import pallas as pl
from jax.experimental.pallas import tpu as pltpu


def _event_encoder_kernel(
    x_ref,                       # (3, T)        rows: [time, x, y]
    w_st_ref, b_st_ref,          # (2H, 3), (2H, 1)   fused temporal|spatial layer
    w1_ref, b1_ref,              # (H, 2H), (H, 1)    encoder[0]
    w2_ref, b2_ref,              # (D, H),  (D, 1)    encoder[2]
    out_ref,                     # (D, T)
):
    x = x_ref[...]               # (3, T)
    w_st = w_st_ref[...]         # (2H, 3)

    # ---- fused temporal/spatial layer: tiny K=3, keep it on the VPU -------
    # cat^T = relu(W_st @ x^T + b_st) computed as 3 broadcast multiply-adds
    # (rank-1 updates); rows 0..H-1 == emb_time, rows H..2H-1 == emb_state,
    # matching torch.cat([emb_time, emb_state], axis=-1).
    cat = b_st_ref[...]                               # (2H, 1) -> broadcast
    cat = cat + w_st[:, 0:1] * x[0:1, :]              # time column
    cat = cat + w_st[:, 1:2] * x[1:2, :]              # state x column
    cat = cat + w_st[:, 2:3] * x[2:3, :]              # state y column
    cat = jnp.maximum(cat, 0.0)                       # (2H, T)

    # ---- encoder[0]: Linear(2H, H) + ReLU (MXU) ----------------------------
    h = jnp.dot(w1_ref[...], cat, preferred_element_type=jnp.float32)
    h = jnp.maximum(h + b1_ref[...], 0.0)             # (H, T)

    # ---- encoder[2]: Linear(H, D) (MXU), lane-dense store ------------------
    out = jnp.dot(w2_ref[...], h, preferred_element_type=jnp.float32)
    out_ref[...] = out + b2_ref[...]                  # (D, T)


def event_encoder(state, time, params, *, tile_n=2048):
    """Fused EventEncoder forward. state:(N,2), time:(N,1) -> (N, head_dim)."""
    N = state.shape[0]
    H = params["w1"].shape[0]          # hidden_dim
    D = params["w2"].shape[0]          # head_dim

    # ---- host-side packing (layout plumbing, done once per call) ----------
    # Block-diagonal fused first-layer weight: [[w_t, 0], [0, w_s]] in (2H, 3).
    w_st = jnp.zeros((2 * H, 3), jnp.float32)
    w_st = w_st.at[:H, 0:1].set(params["w_t"])        # temporal rows, time col
    w_st = w_st.at[H:, 1:3].set(params["w_s"])        # spatial rows, (x, y) cols
    b_st = jnp.concatenate([params["b_t"], params["b_s"]]).reshape(2 * H, 1)
    b1 = params["b1"].reshape(H, 1)
    b2 = params["b2"].reshape(D, 1)

    # Transposed, lane-dense event layout; pad events to a multiple of the tile.
    x = jnp.concatenate([time, state], axis=-1)       # (N, 3) = [time, x, y]
    tile = min(tile_n, ((N + 127) // 128) * 128)      # multiple of 128 lanes
    n_pad = pl.cdiv(N, tile) * tile
    x = jnp.pad(x, ((0, n_pad - N), (0, 0)))
    x_t = x.T                                          # (3, n_pad)

    flops = 2 * n_pad * (3 * 2 * H + 2 * H * H + H * D)
    bytes_accessed = 4 * (
        n_pad * 3 + n_pad * D
        + w_st.size + b_st.size
        + params["w1"].size + b1.size
        + params["w2"].size + b2.size
    )

    out_t = pl.pallas_call(
        _event_encoder_kernel,
        out_shape=jax.ShapeDtypeStruct((D, n_pad), jnp.float32),
        grid=(n_pad // tile,),
        in_specs=[
            pl.BlockSpec((3, tile), lambda i: (0, i)),        # x^T: tiled over events
            pl.BlockSpec((2 * H, 3), lambda i: (0, 0)),       # weights/biases stay
            pl.BlockSpec((2 * H, 1), lambda i: (0, 0)),       # resident in VMEM
            pl.BlockSpec((H, 2 * H), lambda i: (0, 0)),
            pl.BlockSpec((H, 1), lambda i: (0, 0)),
            pl.BlockSpec((D, H), lambda i: (0, 0)),
            pl.BlockSpec((D, 1), lambda i: (0, 0)),
        ],
        out_specs=pl.BlockSpec((D, tile), lambda i: (0, i)),
        compiler_params=pltpu.CompilerParams(
            dimension_semantics=("parallel",)),
        cost_estimate=pl.CostEstimate(
            flops=flops, transcendentals=0, bytes_accessed=bytes_accessed),
    )(x_t, w_st, b_st, params["w1"], b1, params["w2"], b2)

    return out_t[:, :N].T                              # (N, D)


def init_params(key, hidden_dim, head_dim):
    """Deterministic synthetic parameters in PyTorch nn.Linear layout (out, in)."""
    ks = jax.random.split(key, 8)
    f32 = jnp.float32
    return {
        # temporal: Linear(1, hidden_dim)
        "w_t": jax.random.normal(ks[0], (hidden_dim, 1), f32) * 0.1,
        "b_t": jax.random.normal(ks[1], (hidden_dim,), f32) * 0.1,
        # spatial: Linear(2, hidden_dim)
        "w_s": jax.random.normal(ks[2], (hidden_dim, 2), f32) * 0.1,
        "b_s": jax.random.normal(ks[3], (hidden_dim,), f32) * 0.1,
        # encoder[0]: Linear(2*hidden_dim, hidden_dim)
        "w1": jax.random.normal(ks[4], (hidden_dim, 2 * hidden_dim), f32) * 0.1,
        "b1": jax.random.normal(ks[5], (hidden_dim,), f32) * 0.1,
        # encoder[2]: Linear(hidden_dim, head_dim)
        "w2": jax.random.normal(ks[6], (head_dim, hidden_dim), f32) * 0.1,
        "b2": jax.random.normal(ks[7], (head_dim,), f32) * 0.1,
    }


def event_encoder_ref(state, time, p):
    """Pure-JAX reference mirroring the PyTorch forward (W in (out, in) layout)."""
    emb_state = jnp.maximum(state @ p["w_s"].T + p["b_s"], 0.0)
    emb_time = jnp.maximum(time @ p["w_t"].T + p["b_t"], 0.0)
    cat = jnp.concatenate([emb_time, emb_state], axis=-1)
    h = jnp.maximum(cat @ p["w1"].T + p["b1"], 0.0)
    return h @ p["w2"].T + p["b2"]


if __name__ == "__main__":
    hidden_dim, head_dim = 32, 16
    N = 16  # number of sampled events (flattened batch)

    key = jax.random.PRNGKey(0)
    k_state, k_time, k_param = jax.random.split(key, 3)

    state = jax.random.normal(k_state, (N, 2), jnp.float32)   # (x, y) locations
    time = jax.random.normal(k_time, (N, 1), jnp.float32)     # event times
    params = init_params(k_param, hidden_dim, head_dim)

    out = event_encoder(state, time, params)
    out = jax.block_until_ready(out)

    ref = event_encoder_ref(state, time, params)
    assert out.shape == (N, head_dim)
    assert jnp.allclose(out, ref, atol=1e-5, rtol=1e-5), "mismatch vs reference"

    print("KERNEL_OK")
</pallas_src>

<mosaic_0001>
module attributes {stable_mosaic.version = 11 : i64} {
  func.func @_event_encoder_kernel(%arg0: i32, %arg1: memref<3x128xf32, #tpu.memory_space<vmem>>, %arg2: memref<64x3xf32, #tpu.memory_space<vmem>>, %arg3: memref<64x1xf32, #tpu.memory_space<vmem>>, %arg4: memref<32x64xf32, #tpu.memory_space<vmem>>, %arg5: memref<32x1xf32, #tpu.memory_space<vmem>>, %arg6: memref<16x32xf32, #tpu.memory_space<vmem>>, %arg7: memref<16x1xf32, #tpu.memory_space<vmem>>, %arg8: memref<16x128xf32, #tpu.memory_space<vmem>>) attributes {dimension_semantics = [#tpu.dimension_semantics<parallel>], iteration_bounds = array<i64: 1>, scalar_prefetch = 0 : i64, scratch_operands = 0 : i64, tpu.core_type = #tpu.core_type<tc>, window_params = [{transform_indices = @transform_0, window_bounds = array<i64: 3, 128>}, {pipeline_mode = #tpu.pipeline_mode<synchronous>, transform_indices = @transform_1, window_bounds = array<i64: 64, 3>}, {pipeline_mode = #tpu.pipeline_mode<synchronous>, transform_indices = @transform_2, window_bounds = array<i64: 64, 1>}, {pipeline_mode = #tpu.pipeline_mode<synchronous>, transform_indices = @transform_3, window_bounds = array<i64: 32, 64>}, {pipeline_mode = #tpu.pipeline_mode<synchronous>, transform_indices = @transform_4, window_bounds = array<i64: 32, 1>}, {pipeline_mode = #tpu.pipeline_mode<synchronous>, transform_indices = @transform_5, window_bounds = array<i64: 16, 32>}, {pipeline_mode = #tpu.pipeline_mode<synchronous>, transform_indices = @transform_6, window_bounds = array<i64: 16, 1>}, {transform_indices = @transform_7, window_bounds = array<i64: 16, 128>}]} {
    %c0 = arith.constant 0 : index
    %c0_0 = arith.constant 0 : index
    %0 = vector.load %arg1[%c0, %c0_0] : memref<3x128xf32, #tpu.memory_space<vmem>>, vector<3x128xf32>
    %c0_1 = arith.constant 0 : index
    %c0_2 = arith.constant 0 : index
    %1 = vector.load %arg2[%c0_1, %c0_2] : memref<64x3xf32, #tpu.memory_space<vmem>>, vector<64x3xf32>
    %c0_3 = arith.constant 0 : index
    %c0_4 = arith.constant 0 : index
    %2 = vector.load %arg3[%c0_3, %c0_4] : memref<64x1xf32, #tpu.memory_space<vmem>>, vector<64x1xf32>
    %3 = vector.extract_strided_slice %1 {offsets = [0, 0], sizes = [64, 1], strides = [1, 1]} : vector<64x3xf32> to vector<64x1xf32>
    %4 = vector.extract_strided_slice %0 {offsets = [0, 0], sizes = [1, 128], strides = [1, 1]} : vector<3x128xf32> to vector<1x128xf32>
    %5 = vector.broadcast %3 : vector<64x1xf32> to vector<64x128xf32>
    %6 = vector.broadcast %4 : vector<1x128xf32> to vector<64x128xf32>
    %7 = arith.mulf %5, %6 : vector<64x128xf32>
    %8 = vector.broadcast %2 : vector<64x1xf32> to vector<64x128xf32>
    %9 = arith.addf %8, %7 : vector<64x128xf32>
    %10 = vector.extract_strided_slice %1 {offsets = [0, 1], sizes = [64, 1], strides = [1, 1]} : vector<64x3xf32> to vector<64x1xf32>
    %11 = vector.extract_strided_slice %0 {offsets = [1, 0], sizes = [1, 128], strides = [1, 1]} : vector<3x128xf32> to vector<1x128xf32>
    %12 = vector.broadcast %10 : vector<64x1xf32> to vector<64x128xf32>
    %13 = vector.broadcast %11 : vector<1x128xf32> to vector<64x128xf32>
    %14 = arith.mulf %12, %13 : vector<64x128xf32>
    %15 = arith.addf %9, %14 : vector<64x128xf32>
    %16 = vector.extract_strided_slice %1 {offsets = [0, 2], sizes = [64, 1], strides = [1, 1]} : vector<64x3xf32> to vector<64x1xf32>
    %17 = vector.extract_strided_slice %0 {offsets = [2, 0], sizes = [1, 128], strides = [1, 1]} : vector<3x128xf32> to vector<1x128xf32>
    %18 = vector.broadcast %16 : vector<64x1xf32> to vector<64x128xf32>
    %19 = vector.broadcast %17 : vector<1x128xf32> to vector<64x128xf32>
    %20 = arith.mulf %18, %19 : vector<64x128xf32>
    %21 = arith.addf %15, %20 : vector<64x128xf32>
    %cst = arith.constant 0.000000e+00 : f32
    %22 = vector.broadcast %cst : f32 to vector<64x128xf32>
    %23 = arith.maximumf %21, %22 : vector<64x128xf32>
    %c0_5 = arith.constant 0 : index
    %c0_6 = arith.constant 0 : index
    %24 = vector.load %arg4[%c0_5, %c0_6] : memref<32x64xf32, #tpu.memory_space<vmem>>, vector<32x64xf32>
    %cst_7 = arith.constant dense<0.000000e+00> : vector<32x128xf32>
    %25 = tpu.matmul %24, %23, %cst_7 {dimension_numbers = #tpu.dot_dimension_numbers<[1], [0], [0], [1], [0, 0, 1, 1], [], []>} : vector<32x64xf32>, vector<64x128xf32>, vector<32x128xf32> -> vector<32x128xf32>
    %c0_8 = arith.constant 0 : index
    %c0_9 = arith.constant 0 : index
    %26 = vector.load %arg5[%c0_8, %c0_9] : memref<32x1xf32, #tpu.memory_space<vmem>>, vector<32x1xf32>
    %27 = vector.broadcast %26 : vector<32x1xf32> to vector<32x128xf32>
    %28 = arith.addf %25, %27 : vector<32x128xf32>
    %cst_10 = arith.constant 0.000000e+00 : f32
    %29 = vector.broadcast %cst_10 : f32 to vector<32x128xf32>
    %30 = arith.maximumf %28, %29 : vector<32x128xf32>
    %c0_11 = arith.constant 0 : index
    %c0_12 = arith.constant 0 : index
    %31 = vector.load %arg6[%c0_11, %c0_12] : memref<16x32xf32, #tpu.memory_space<vmem>>, vector<16x32xf32>
    %cst_13 = arith.constant dense<0.000000e+00> : vector<16x128xf32>
    %32 = tpu.matmul %31, %30, %cst_13 {dimension_numbers = #tpu.dot_dimension_numbers<[1], [0], [0], [1], [0, 0, 1, 1], [], []>} : vector<16x32xf32>, vector<32x128xf32>, vector<16x128xf32> -> vector<16x128xf32>
    %c0_14 = arith.constant 0 : index
    %c0_15 = arith.constant 0 : index
    %33 = vector.load %arg7[%c0_14, %c0_15] : memref<16x1xf32, #tpu.memory_space<vmem>>, vector<16x1xf32>
    %34 = vector.broadcast %33 : vector<16x1xf32> to vector<16x128xf32>
    %35 = arith.addf %32, %34 : vector<16x128xf32>
    %c0_16 = arith.constant 0 : index
    %c0_17 = arith.constant 0 : index
    %36 = vector.load %arg8[%c0_16, %c0_17] : memref<16x128xf32, #tpu.memory_space<vmem>>, vector<16x128xf32>
    tpu.vector_store %arg8[%c0_16, %c0_17], %35 {strides = array<i32>} : memref<16x128xf32, #tpu.memory_space<vmem>>, vector<16x128xf32>,
    return
  }
  func.func @transform_0(%arg0: i32) -> (i32, i32) {
    %c0_i32 = arith.constant 0 : i32
    %c0_i32_0 = arith.constant 0 : i32
    return %c0_i32, %arg0 : i32, i32
  }
  func.func @transform_1(%arg0: i32) -> (i32, i32) {
    %c0_i32 = arith.constant 0 : i32
    %c0_i32_0 = arith.constant 0 : i32
    %c0_i32_1 = arith.constant 0 : i32
    return %c0_i32, %c0_i32_0 : i32, i32
  }
  func.func @transform_2(%arg0: i32) -> (i32, i32) {
    %c0_i32 = arith.constant 0 : i32
    %c0_i32_0 = arith.constant 0 : i32
    %c0_i32_1 = arith.constant 0 : i32
    return %c0_i32, %c0_i32_0 : i32, i32
  }
  func.func @transform_3(%arg0: i32) -> (i32, i32) {
    %c0_i32 = arith.constant 0 : i32
    %c0_i32_0 = arith.constant 0 : i32
    %c0_i32_1 = arith.constant 0 : i32
    return %c0_i32, %c0_i32_0 : i32, i32
  }
  func.func @transform_4(%arg0: i32) -> (i32, i32) {
    %c0_i32 = arith.constant 0 : i32
    %c0_i32_0 = arith.constant 0 : i32
    %c0_i32_1 = arith.constant 0 : i32
    return %c0_i32, %c0_i32_0 : i32, i32
  }
  func.func @transform_5(%arg0: i32) -> (i32, i32) {
    %c0_i32 = arith.constant 0 : i32
    %c0_i32_0 = arith.constant 0 : i32
    %c0_i32_1 = arith.constant 0 : i32
    return %c0_i32, %c0_i32_0 : i32, i32
  }
  func.func @transform_6(%arg0: i32) -> (i32, i32) {
    %c0_i32 = arith.constant 0 : i32
    %c0_i32_0 = arith.constant 0 : i32
    %c0_i32_1 = arith.constant 0 : i32
    return %c0_i32, %c0_i32_0 : i32, i32
  }
  func.func @transform_7(%arg0: i32) -> (i32, i32) {
    %c0_i32 = arith.constant 0 : i32
    %c0_i32_0 = arith.constant 0 : i32
    return %c0_i32, %arg0 : i32, i32
  }
}

</mosaic_0001>

<bundles_post_ra>
// kernel: tpu_custom_call.1
= control target key start
LH: loop header
LB: loop body
LE: loop exit
PB: predicated region body
PF: predicated region fallthrough
CT: control target
= control target key end

     0   :  { %v631_v2 = vmov 0   ;;  %s831_s0 = inlined_call_operand.vmem [shape: f32[3,128], index: 0, kind: input, shape index: {}]   ;;  %s832_s1 = inlined_call_operand.vmem [shape: f32[64,3], index: 1, kind: input, shape index: {}]   ;;  %s833_s2 = inlined_call_operand.vmem [shape: f32[64,1], index: 2, kind: input, shape index: {}]   ;;  %s834_s3 = inlined_call_operand.vmem [shape: f32[32,64], index: 3, kind: input, shape index: {}]   ;;  %s835_s4 = inlined_call_operand.vmem [shape: f32[32,1], index: 4, kind: input, shape index: {}]   ;;  %s836_s5 = inlined_call_operand.vmem [shape: f32[16,32], index: 5, kind: input, shape index: {}]   ;;  %s837_s6 = inlined_call_operand.vmem [shape: f32[16,1], index: 6, kind: input, shape index: {}]   ;;  %s838_s7 = inlined_call_operand.hbm [shape: f32[16,128], index: 7, kind: output, shape index: {}]  }
   0x1   :  { %v36_v0 = vld [vmem:[%s833_s2] sm:$0xff]  ;;  %588 = vset.pattern.permute.xlu1 %v631_v2  ;;  %587 = vset.pattern.permute.xlu0 %v631_v2  ;;  %v37_v3 = vld [vmem:[%s833_s2 + $0x8] sm:$0xff] }
   0x2   :  { %v28_v1 = vld [vmem:[%s832_s1] sm:$0xff]  ;;  %98 = vperm.xlu1 %588, %v36_v0   ;;  %v29_v4 = vld [vmem:[%s832_s1 + $0x8] sm:$0xff] }
   0x3   :  { %46 = vperm.xlu0 %587, %v28_v1  }
   0x4   :  { %12 = vsyncpa [#allocation3], 0  ;;  %v31_v5 = vld [vmem:[%s832_s1 + $0x18] sm:$0xff]  ;;  %v632_v6 = vmov 1   ;;  %v38_v7 = vld [vmem:[%s833_s2 + $0x10] sm:$0xff]  ;;  %v633_v11 = vmov 2   ;;  %v84_v33 = vlaneseq }
   0x5   :  { %v30_v8 = vld [vmem:[%s832_s1 + $0x10] sm:$0xff]  ;;  %v33_v9 = vld [vmem:[%s832_s1 + $0x28] sm:$0xff]  ;;  %v40_v10 = vld [vmem:[%s833_s2 + $0x20] sm:$0xff]  ;;  %vm284_vm0 = vcmask 523264   ;;  %vm400_vm1 = vcmask 261120   ;;  %s634_s30 = smov [#allocation2]  }
   0x6   :  { %103 = vperm.xlu1 %588, %v37_v3   ;;  %v35_v12 = vld [vmem:[%s832_s1 + $0x38] sm:$0xff]  ;;  %v42_v14 = vld [vmem:[%s833_s2 + $0x30] sm:$0xff]  ;;  %v32_v15 = vld [vmem:[%s832_s1 + $0x20] sm:$0xff]  ;;  %v85_v36 = vshrl.u32 %v84_v33, 7 }
   0x7   :  { %51 = vperm.xlu0 %587, %v29_v4   ;;  %v39_v13 = vld [vmem:[%s833_s2 + $0x18] sm:$0xff]  ;;  %v34_v16 = vld [vmem:[%s832_s1 + $0x30] sm:$0xff]  ;;  %v41_v17 = vld [vmem:[%s833_s2 + $0x28] sm:$0xff]  ;;  %s489_s1 = sshll.u32 %s634_s30, 4  ;;  %s490_s1 = int_to_ptr.vmem [resolvable:$true] %s489_s1 }
   0x8   :  { %v43_v18 = vld [vmem:[%s833_s2 + $0x38] sm:$0xff]  ;;  %v256_v19 = vld [vmem:[%s834_s3] sm:$0xff]  ;;  %v262_v21 = vld [vmem:[%s835_s4 + $0x10] sm:$0xff]  ;;  %v86_v39 = vsub.s32 0, %v85_v36  ;;  %v178_v40 = vsub.s32 1, %v85_v36  ;;  %v230_v46 = vsub.s32 2, %v85_v36  ;;  %p612_p1 = scmp.lt.s32.totalorder %s490_s1, %s490_s1 }
   0x9   :  { %540 = vmatprep.mubr.msk.f32.mxu0 %vm284_vm0, %v256_v19  ;;  %v260_v20 = vld [vmem:[%s835_s4] sm:$0xff]  ;;  %v261_v22 = vld [vmem:[%s835_s4 + $0x8] sm:$0xff]  ;;  %v263_v24 = vld [vmem:[%s835_s4 + $0x18] sm:$0xff]  ;;  %s607_s8 = scalar_lea.vmem %s490_s1, 256 }
   0xa   :  { %589 = vset.pattern.permute.xlu1 %v632_v6  ;;  %v389_v23 = vld [vmem:[%s837_s6 + $0x8] sm:$0xff]  ;;  %v388_v25 = vld [vmem:[%s837_s6] sm:$0xff]  ;;  %p608_p0 = scmp.ne.s32.totalorder %s490_s1, %s607_s8  ;;  %p613_p2 = scmp.lt.s32.totalorder %s607_s8, %s607_s8 }
   0xb   :  { %61 = vperm.xlu0 %587, %v31_v5   ;;  %149 = vperm.xlu1 %589, %v29_v4   ;;  %v27_v41 = vld [vmem:[%s831_s0] sm:$0x7] }
   0xc   :  { %v764_v44 = vrot.slane %v27_v41, %v86_v39  ;;  %v766_v45 = vrot.slane %v27_v41, %v178_v40  ;;  %v773_v52 = vrot.slane %v27_v41, %v230_v46  ;;  %p614_p3 = por %p613_p2, %p612_p1 }
   0xe   :  { %p615_p4 = pnand %p614_p3, %p608_p0 }
   0xf   :  { %108 = vperm.xlu0 %587, %v38_v7   ;;  %590 = vset.pattern.permute.xlu1 %v631_v2 }
  0x10   :  { %56 = vperm.xlu1 %590, %v30_v8  }
  0x13   :  { %71 = vperm.xlu0 %587, %v33_v9  }
  0x14   :  { %591 = vset.pattern.permute.xlu1 %v633_v11 }
  0x15   :  { %197 = vperm.xlu1 %591, %v28_v1  }
  0x17   :  { %118 = vperm.xlu0 %587, %v40_v10  }
  0x19   :  { %201 = vperm.xlu1 %591, %v29_v4  }
  0x1b   :  { %81 = vperm.xlu0 %587, %v35_v12  }
  0x1d   :  { %592 = vset.pattern.permute.xlu1 %v631_v2 }
  0x1e   :  { %113 = vperm.xlu1 %592, %v39_v13  }
  0x1f   :  { %128 = vperm.xlu0 %587, %v42_v14  }
  0x22   :  { %593 = vset.pattern.permute.xlu1 %v632_v6 }
  0x23   :  { %600 = vset.pattern.permute.xlu0 %v632_v6  ;;  %157 = vperm.xlu1 %593, %v31_v5  }
  0x24   :  { %145 = vperm.xlu0 %600, %v28_v1  }
  0x27   :  { %594 = vset.pattern.permute.xlu1 %v631_v2 }
  0x28   :  { %153 = vperm.xlu0 %600, %v30_v8   ;;  %66 = vperm.xlu1 %594, %v32_v15  }
  0x2c   :  { %161 = vperm.xlu0 %600, %v32_v15   ;;  %595 = vset.pattern.permute.xlu1 %v633_v11 }
  0x2d   :  { %205 = vperm.xlu1 %595, %v30_v8  }
  0x30   :  { %169 = vperm.xlu0 %600, %v34_v16  }
  0x31   :  { %209 = vperm.xlu1 %595, %v31_v5  }
  0x34   :  { %604 = vset.pattern.permute.xlu0 %v633_v11 }
  0x35   :  { %225 = vperm.xlu0 %604, %v35_v12   ;;  %596 = vset.pattern.permute.xlu1 %v631_v2 }
  0x36   :  { %123 = vperm.xlu1 %596, %v41_v17  }
  0x39   :  { %606 = vset.pattern.permute.xlu0 %v631_v2 }
  0x3a   :  { %597 = vset.pattern.permute.xlu1 %v632_v6  ;;  %276 = vperm.xlu0 %606, %v262_v21  }
  0x3b   :  { %165 = vperm.xlu1 %597, %v33_v9  }
  0x3e   :  { %397 = vperm.xlu0 %606, %v389_v23  }
  0x3f   :  { %598 = vset.pattern.permute.xlu1 %v631_v2 }
  0x40   :  { %76 = vperm.xlu1 %598, %v34_v16  }
  0x44   :  { %599 = vset.pattern.permute.xlu1 %v633_v11 }
  0x45   :  { %213 = vperm.xlu1 %599, %v32_v15  }
  0x49   :  { %217 = vperm.xlu1 %599, %v33_v9  }
  0x4d   :  { %601 = vset.pattern.permute.xlu1 %v631_v2 }
  0x4e   :  { %133 = vperm.xlu1 %601, %v43_v18  }
  0x52   :  { %602 = vset.pattern.permute.xlu1 %v632_v6 }
  0x53   :  { %173 = vperm.xlu1 %602, %v35_v12  }
  0x57   :  { %603 = vset.pattern.permute.xlu1 %v633_v11 }
  0x58   :  { %221 = vperm.xlu1 %603, %v34_v16  }
  0x5c   :  { %605 = vset.pattern.permute.xlu1 %v631_v2 }
  0x5d   :  { %266 = vperm.xlu1 %605, %v260_v20  }
  0x61   :  { %271 = vperm.xlu1 %605, %v261_v22  }
  0x65   :  { %281 = vperm.xlu1 %605, %v263_v24  }
  0x69   :  { %392 = vperm.xlu1 %605, %v388_v25  }
  0x81   :  { %v99_v26 = vpop.permute.xlu1 %98 }
  0x82   :  { %v47_v27 = vpop.permute.xlu0 %46 }
  0x83   :  { %v88_v50 = vmul.f32 %v764_v44, %v47_v27 }
  0x85   :  { %v104_v28 = vpop.permute.xlu1 %103  ;;  %v136_v57 = vadd.f32 %v99_v26, %v88_v50 }
  0x86   :  { %v52_v29 = vpop.permute.xlu0 %51 }
  0x87   :  { %v89_v47 = vmul.f32 %v764_v44, %v52_v29 }
  0x89   :  { %v137_v53 = vadd.f32 %v104_v28, %v89_v47 }
  0x8a   :  { %v62_v30 = vpop.permute.xlu0 %61  ;;  %v150_v31 = vpop.permute.xlu1 %149 }
  0x8b   :  { %v181_v51 = vmul.f32 %v766_v45, %v150_v31  ;;  %v91_v5 = vmul.f32 %v764_v44, %v62_v30 }
  0x8d   :  { %v189_v58 = vadd.f32 %v181_v51, %v137_v53 }
  0x8e   :  { %v109_v32 = vpop.permute.xlu0 %108 }
  0x8f   :  { %v57_v34 = vpop.permute.xlu1 %56 }
  0x90   :  { %v90_v2 = vmul.f32 %v764_v44, %v57_v34 }
  0x92   :  { %v757_v35 = vpop.permute.xlu0 %71  ;;  %v138_v9 = vadd.f32 %v109_v32, %v90_v2  ;;  %v386_v2 = vld [vmem:[%s836_s5] sm:$0xff] }
  0x93   :  { %v93_v30 = vmul.f32 %v764_v44, %v757_v35  ;;  %554 = vmatprep.mubr.msk.f32.mxu1 %vm400_vm1, %v386_v2 }
  0x94   :  { %v198_v37 = vpop.permute.xlu1 %197 }
  0x95   :  { %v232_v60 = vmul.f32 %v773_v52, %v198_v37 }
  0x96   :  { %v119_v38 = vpop.permute.xlu0 %118 }
  0x98   :  { %v202_v42 = vpop.permute.xlu1 %201 }
  0x99   :  { %v233_v54 = vmul.f32 %v773_v52, %v202_v42 }
  0x9a   :  { %v762_v43 = vpop.permute.xlu0 %81 }
  0x9b   :  { %v241_v61 = vadd.f32 %v233_v54, %v189_v58  ;;  %v95_v35 = vmul.f32 %v764_v44, %v762_v43 }
  0x9d   :  { %v114_v48 = vpop.permute.xlu1 %113  ;;  %v249_v3 = vmax.f32 %v241_v61, 0.0 }
  0x9e   :  { %v769_v49 = vpop.permute.xlu0 %128  ;;  %v139_v12 = vadd.f32 %v114_v48, %v91_v5 }
  0xa2   :  { %v158_v55 = vpop.permute.xlu1 %157 }
  0xa3   :  { %v146_v56 = vpop.permute.xlu0 %145  ;;  %v183_v10 = vmul.f32 %v766_v45, %v158_v55 }
  0xa4   :  { %v180_v59 = vmul.f32 %v766_v45, %v146_v56 }
  0xa5   :  { %v191_v15 = vadd.f32 %v183_v10, %v139_v12 }
  0xa6   :  { %v188_v62 = vadd.f32 %v180_v59, %v136_v57 }
  0xa7   :  { %v67_v63 = vpop.permute.xlu1 %66  ;;  %v154_v1 = vpop.permute.xlu0 %153 }
  0xa8   :  { %v240_v0 = vadd.f32 %v232_v60, %v188_v62  ;;  %v182_v6 = vmul.f32 %v766_v45, %v154_v1  ;;  %v92_v24 = vmul.f32 %v764_v44, %v67_v63 }
  0xaa   :  { %v248_v4 = vmax.f32 %v240_v0, 0.0  ;;  %v190_v13 = vadd.f32 %v182_v6, %v138_v9  ;;  %v140_v27 = vadd.f32 %v119_v38, %v92_v24 }
  0xab   :  { %v162_v26 = vpop.permute.xlu0 %161 }
  0xac   :  { %v557_v7 = vpack.c.bf16 %v249_v3, %v248_v4  ;;  %v206_v8 = vpop.permute.xlu1 %205  ;;  %v184_v28 = vmul.f32 %v766_v45, %v162_v26 }
  0xad   :  { %v234_v11 = vmul.f32 %v773_v52, %v206_v8 }
  0xae   :  { %558 = vmatprep.subr.bf16.mxu0 %v557_v7  ;;  %v192_v33 = vadd.f32 %v184_v28, %v140_v27 }
  0xaf   :  { %560 = vmatpush3.bf16.msra.mxu0 %v557_v7  ;;  %v242_v16 = vadd.f32 %v234_v11, %v190_v13  ;;  %v170_v42 = vpop.permute.xlu0 %169 }
  0xb0   :  { %v210_v14 = vpop.permute.xlu1 %209  ;;  %v186_v57 = vmul.f32 %v766_v45, %v170_v42 }
  0xb1   :  { %v235_v17 = vmul.f32 %v773_v52, %v210_v14  ;;  %v250_v19 = vmax.f32 %v242_v16, 0.0 }
  0xb3   :  { %v243_v18 = vadd.f32 %v235_v17, %v191_v15 }
  0xb4   :  { %v226_v51 = vpop.permute.xlu0 %225 }
  0xb5   :  { %v251_v20 = vmax.f32 %v243_v18, 0.0  ;;  %v124_v21 = vpop.permute.xlu1 %123  ;;  %v239_v58 = vmul.f32 %v773_v52, %v226_v51 }
  0xb6   :  { %v141_v34 = vadd.f32 %v124_v21, %v93_v30  ;;  %v387_v21 = vld [vmem:[%s836_s5 + $0x8] sm:$0xff] }
  0xb7   :  { %v561_v22 = vpack.c.bf16 %v251_v20, %v250_v19 }
  0xb9   :  { %562 = vmatprep.subr.bf16.mxu0 %v561_v22  ;;  %v277_v13 = vpop.permute.xlu0 %276 }
  0xba   :  { %v166_v23 = vpop.permute.xlu1 %165  ;;  %564 = vmatpush3.bf16.msra.mxu0 %v561_v22 }
  0xbb   :  { %v185_v31 = vmul.f32 %v766_v45, %v166_v23 }
  0xbd   :  { %v193_v37 = vadd.f32 %v185_v31, %v141_v34  ;;  %v398_v22 = vpop.permute.xlu0 %397 }
  0xbf   :  { %v77_v25 = vpop.permute.xlu1 %76 }
  0xc0   :  { %v94_v50 = vmul.f32 %v764_v44, %v77_v25 }
  0xc2   :  { %v142_v56 = vadd.f32 %v769_v49, %v94_v50  ;;  %v257_v49 = vld [vmem:[%s834_s3 + $0x8] sm:$0xff] }
  0xc4   :  { %v214_v29 = vpop.permute.xlu1 %213  ;;  %v194_v61 = vadd.f32 %v186_v57, %v142_v56 }
  0xc5   :  { %v236_v32 = vmul.f32 %v773_v52, %v214_v29 }
  0xc7   :  { %v244_v39 = vadd.f32 %v236_v32, %v192_v33 }
  0xc8   :  { %v218_v36 = vpop.permute.xlu1 %217 }
  0xc9   :  { %v237_v40 = vmul.f32 %v773_v52, %v218_v36  ;;  %v252_v38 = vmax.f32 %v244_v39, 0.0 }
  0xcb   :  { %v245_v41 = vadd.f32 %v237_v40, %v193_v37 }
  0xcd   :  { %v253_v46 = vmax.f32 %v245_v41, 0.0  ;;  %v134_v47 = vpop.permute.xlu1 %133 }
  0xce   :  { %v143_v54 = vadd.f32 %v134_v47, %v95_v35 }
  0xcf   :  { %v565_v48 = vpack.c.bf16 %v253_v46, %v252_v38 }
  0xd1   :  { %566 = vmatprep.subr.bf16.mxu0 %v565_v48 }
  0xd2   :  { %v174_v53 = vpop.permute.xlu1 %173  ;;  %568 = vmatpush3.bf16.msra.mxu0 %v565_v48 }
  0xd3   :  { %v187_v55 = vmul.f32 %v766_v45, %v174_v53  ;;  %v258_v45 = vld [vmem:[%s834_s3 + $0x10] sm:$0xff] }
  0xd5   :  { %v195_v59 = vadd.f32 %v187_v55, %v143_v54 }
  0xd7   :  { %v222_v60 = vpop.permute.xlu1 %221  ;;  %v247_v62 = vadd.f32 %v239_v58, %v195_v59 }
  0xd8   :  { %v238_v63 = vmul.f32 %v773_v52, %v222_v60  ;;  %v259_v52 = vld [vmem:[%s834_s3 + $0x18] sm:$0xff] }
  0xd9   :  { %v255_v44 = vmax.f32 %v247_v62, 0.0 }
  0xda   :  { %v246_v43 = vadd.f32 %v238_v63, %v194_v61 }
  0xdc   :  { %v254_v0 = vmax.f32 %v246_v43, 0.0  ;;  %v267_v3 = vpop.permute.xlu1 %266 }
  0xde   :  { %v569_v1 = vpack.c.bf16 %v255_v44, %v254_v0 }
  0xe0   :  { %570 = vmatprep.subr.bf16.mxu0 %v569_v1  ;;  %v272_v4 = vpop.permute.xlu1 %271 }
  0xe1   :  { %572 = vmatpush3.bf16.msra.mxu0 %v569_v1 }
  0xe4   :  { %541 = vmatmul.mubr.msk.f32.vlgmr.msra.gmra.mrb[0].mxu0 %vm284_vm0, %v257_v49  ;;  %v282_v10 = vpop.permute.xlu1 %281 }
  0xe5   :  { %543 = vmatprep.mubr.msk.f32.mxu0 %vm284_vm0, %v258_v45 }
  0xe8   :  { %544 = vmatmul.mubr.msk.f32.gmra.mrb[2].mxu0 %vm284_vm0, %v259_v52  ;;  %v393_v24 = vpop.permute.xlu1 %392 }
 0x1b7   :  { %v542_v5 = vpop.f32.mrb[0].mxu0 }
 0x1b8   :  { %v369_v6 = vadd.f32 %v542_v5, %v272_v4  ;;  %v363_v7 = vpop.f32.mrb[1].mxu0 }
 0x1b9   :  { %v364_v8 = vadd.f32 %v363_v7, %v267_v3 }
 0x1ba   :  { %v383_v9 = vmax.f32 %v369_v6, 0.0 }
 0x1bb   :  { %v382_v11 = vmax.f32 %v364_v8, 0.0  ;;  %v545_v12 = vpop.f32.mrb[2].mxu0 }
 0x1bc   :  { %v379_v14 = vadd.f32 %v545_v12, %v282_v10  ;;  %v373_v15 = vpop.f32.mrb[3].mxu0 }
 0x1bd   :  { %v374_v16 = vadd.f32 %v373_v15, %v277_v13  ;;  %v573_v17 = vpack.c.bf16 %v383_v9, %v382_v11 }
 0x1be   :  { %v385_v18 = vmax.f32 %v379_v14, 0.0 }
 0x1bf   :  { %v384_v19 = vmax.f32 %v374_v16, 0.0  ;;  %574 = vmatprep.subr.bf16.mxu1 %v573_v17 }
 0x1c0   :  { %576 = vmatpush3.bf16.msra.mxu1 %v573_v17 }
 0x1c1   :  { %v577_v20 = vpack.c.bf16 %v385_v18, %v384_v19 }
 0x1c3   :  { %578 = vmatprep.subr.bf16.mxu1 %v577_v20 }
 0x1c4   :  { %580 = vmatpush3.bf16.msra.mxu1 %v577_v20 }
 0x1c7   :  { %555 = vmatmul.mubr.msk.f32.vlgmr.msra.gmra.mrb[0].mxu1 %vm400_vm1, %v387_v21 }
 0x29a   :  { %v556_v23 = vpop.f32.mrb[0].mxu1 }
 0x29b   :  { %v479_v25 = vadd.f32 %v556_v23, %v398_v22  ;;  %v473_v26 = vpop.f32.mrb[1].mxu1 }
 0x29c   :  { %v474_v27 = vadd.f32 %v473_v26, %v393_v24 }
 0x29d   :  { %483 = vst [vmem:[#allocation2 + $0x8] sm:$0xff] %v479_v25 }
 0x29e   :  { %482 = vst [vmem:[#allocation2] sm:$0xff] %v474_v27 }
 0x29f   :  { %618 = shalt.err (!%p615_p4)
}
 0x2a0   :  { %s619_s10 = scalar_lea.hbm %s838_s7, 256 }
 0x2a1   :  { %p620_p5 = scmp.ne.s32.totalorder %s838_s7, %s619_s10  ;;  %p623_p6 = scmp.lt.u32.totalorder %s619_s10, %s838_s7 }
 0x2a3   :  { %p625_p7 = pnand %p623_p6, %p620_p5 }
 0x2a5   :  { %628 = shalt.err (!%p625_p7)
}
 0x2a6   :  { %s635_s14 = smov 128   ;;  %s636_s15 = smov 8  }
 0x2a7   :  { %495 = dma.vmem_to_hbm [thread:$0]  %s490_s1, 256, %s838_s7, [#allocation3], %s635_s14, %s635_s14, %s636_s15  }
 0x2a8   :  { %629 = dma.done.wait [#allocation3], 256  }
 0x2a9   :  { %630 = vsyncadd [#allocation3], 4294967040 }
 0x2aa   :  { %499 = vsyncpa [#allocation3], 1 }

</bundles_post_ra>
